<compile_context>
chip_gen: v5e
topology: v5e:2x2
jax: 0.10.0
libtpu: 0.0.40
codegen_flags: <defaults>
</compile_context>

<pallas_src>
import functools

import numpy as np

import jax
import jax.numpy as jnp
from jax import lax
from jax.experimental import pallas as pl
from jax.experimental.pallas import tpu as pltpu

B = 8          # batch_size
D_IN = 32      # input feature dim
HID = 64       # base_network hidden dim
BOT = 128      # bottleneck output dim (fixed by cls_fc = nn.Linear(128, n_class))
N_CLASS = 4    # config['n_class']
LANES = 128    # lane width everything is padded to (lane-dense loads/stores)

KERNEL_MUL = 2.0
KERNEL_NUM = 5

_VMEM = pltpu.MemorySpace.VMEM


def _align8(x):
    return ((x + 7) // 8) * 8


def _coef_matrix(bsz):
    """Static +/-1 pair-selection matrix of mmd_rbf_accelerate (depends only on bsz)."""
    n = 2 * bsz
    c = np.zeros((n, n), np.float32)
    for i in range(bsz):
        s1, s2 = i, (i + 1) % bsz
        t1, t2 = s1 + bsz, s2 + bsz
        c[s1, s2] += 1.0
        c[t1, t2] += 1.0
        c[s1, t2] -= 1.0
        c[s2, t1] -= 1.0
    return c


# ---------------------------------------------------------------------------
# Parameter slabs (one contiguous (rows, 128) f32 array each, 8-row aligned
# sections, zero padded).  Zero padding makes every in-kernel matmul full
# 128-lane width with no correctness impact.
# ---------------------------------------------------------------------------
def _train_layout(bsz):
    n = 2 * bsz
    r_w1 = 0                       # D_IN rows    : w1 (D_IN, HID) -> lanes [:HID]
    r_b1 = _align8(D_IN)           # 1 row        : b1
    r_w2 = r_b1 + 8                # BOT rows     : w2 (HID, BOT), rows >= HID stay 0
    r_b2 = r_w2 + BOT              # 1 row        : b2
    r_wc = r_b2 + 8                # BOT rows     : wc (BOT, N_CLASS) -> lanes [:N_CLASS]
    r_bc = r_wc + BOT              # 1 row        : bc
    r_coef = r_bc + 8              # n rows       : coef (n, n) -> lanes [:n]
    rows = r_coef + _align8(n)
    return dict(w1=r_w1, b1=r_b1, w2=r_w2, b2=r_b2, wc=r_wc, bc=r_bc,
                coef=r_coef, rows=rows)


def _eval_layout():
    r_w1 = 0
    r_b1 = _align8(D_IN)
    r_wc = r_b1 + 8                # BOT rows : wc_eff = w2 @ wc, rows >= HID stay 0
    r_bc = r_wc + BOT
    rows = r_bc + 8
    return dict(w1=r_w1, b1=r_b1, wc=r_wc, bc=r_bc, rows=rows)


def _put(slab, row, a):
    a = np.asarray(a, np.float32)
    slab[row:row + a.shape[0], :a.shape[1]] = a


def build_train_slab(params, bsz):
    lay = _train_layout(bsz)
    slab = np.zeros((lay["rows"], LANES), np.float32)
    _put(slab, lay["w1"], params["w1"])          # (D_IN, HID)
    _put(slab, lay["b1"], params["b1"])          # (1, HID)
    _put(slab, lay["w2"], params["w2"])          # (HID, BOT)
    _put(slab, lay["b2"], params["b2"])          # (1, BOT)
    _put(slab, lay["wc"], params["wc"])          # (BOT, N_CLASS)
    _put(slab, lay["bc"], params["bc"])          # (1, N_CLASS)
    _put(slab, lay["coef"], _coef_matrix(bsz))   # (2*bsz, 2*bsz)
    return jnp.asarray(slab)


def build_eval_slab(params):
    lay = _eval_layout()
    slab = np.zeros((lay["rows"], LANES), np.float32)
    w2 = np.asarray(params["w2"], np.float32)
    wc = np.asarray(params["wc"], np.float32)
    b2 = np.asarray(params["b2"], np.float32)
    bc = np.asarray(params["bc"], np.float32)
    _put(slab, lay["w1"], params["w1"])
    _put(slab, lay["b1"], params["b1"])
    _put(slab, lay["wc"], w2 @ wc)               # fold cls_fc into the bottleneck
    _put(slab, lay["bc"], b2 @ wc + bc)
    return jnp.asarray(slab)


# ---------------------------------------------------------------------------
# Training kernel: one grid step = one (source, target) minibatch.
#   SharedNet([src;tgt]) -> mmd_rbf_accelerate loss + cls_fc(src feats)
# ---------------------------------------------------------------------------
def _train_kernel(src_ref, tgt_ref, slab_ref, logits_ref, loss_ref, *, bsz, lay):
    n = 2 * bsz

    # stack [source; target] in VMEM (two adjacent 8-row sublane tiles)
    x = jnp.concatenate([src_ref[0], tgt_ref[0]], axis=0)              # (2B, D_IN)

    w1 = slab_ref[lay["w1"]:lay["w1"] + D_IN, :]                       # (D_IN, 128)
    b1 = slab_ref[lay["b1"]:lay["b1"] + 1, :]                          # (1, 128)
    w2 = slab_ref[lay["w2"]:lay["w2"] + BOT, :]                        # (128, 128)
    b2 = slab_ref[lay["b2"]:lay["b2"] + 1, :]                          # (1, 128)

    # SharedNet (base Linear+ReLU, bottleneck Linear); padded lanes stay 0
    h = jnp.maximum(jnp.dot(x, w1, preferred_element_type=jnp.float32) + b1, 0.0)
    feat = jnp.dot(h, w2, preferred_element_type=jnp.float32) + b2     # (2B, 128)

    # pairwise squared L2 via the Gram matrix; both norm broadcasts come from
    # diag(gram) -> no (2B,1)->(1,2B) transpose relayout.
    gram = lax.dot_general(feat, feat, (((1,), (1,)), ((), ())),
                           preferred_element_type=jnp.float32)         # (2B, 2B)
    rid = lax.broadcasted_iota(jnp.int32, (n, n), 0)
    cid = lax.broadcasted_iota(jnp.int32, (n, n), 1)
    gd = gram * (rid == cid).astype(jnp.float32)                       # diag(gram)
    sq_col = jnp.sum(gd, axis=1, keepdims=True)                        # (2B, 1)
    sq_row = jnp.sum(gd, axis=0, keepdims=True)                        # (1, 2B)
    l2 = jnp.maximum(sq_col + sq_row - 2.0 * gram, 0.0)

    # multi-bandwidth RBF kernel (fix_sigma=None path of mmd_rbf_accelerate)
    bw = jnp.sum(l2, keepdims=True) * (
        1.0 / (float(n * n - n) * (KERNEL_MUL ** (KERNEL_NUM // 2))))  # (1, 1)
    inv_bw = pl.reciprocal(bw, approx=True)                            # EUP slot
    scaled = (-l2) * inv_bw                                            # = -l2 / bw

    # sum_i exp(scaled / 2^i), i=0..4  ==  k + k^2 + k^4 + k^8 + k^16,
    # k = exp(scaled / 16): one EUP exp, four VPU squarings.
    k = jnp.exp(scaled * (1.0 / (KERNEL_MUL ** (KERNEL_NUM - 1))))
    kern = k
    for _ in range(KERNEL_NUM - 1):
        k = k * k
        kern = kern + k

    coef = slab_ref[lay["coef"]:lay["coef"] + n, 0:n]                  # (2B, 2B)
    loss = jnp.sum(kern * coef, keepdims=True) * (1.0 / float(bsz))    # (1, 1)
    loss_ref[0] = jnp.broadcast_to(loss, (1, LANES))                   # lane-dense store

    # cls_fc on the source half only (wc/bc zero-padded to 128 lanes)
    wc = slab_ref[lay["wc"]:lay["wc"] + BOT, :]
    bc = slab_ref[lay["bc"]:lay["bc"] + 1, :]
    logits_ref[0] = (jnp.dot(feat[:bsz, :], wc, preferred_element_type=jnp.float32)
                     + bc)


@jax.jit
def _train_call(src_steps, tgt_steps, slab):
    """src_steps/tgt_steps: (NSTEPS, B, D_IN). Returns (NSTEPS,B,N_CLASS), (NSTEPS,)."""
    nsteps, bsz, d_in = src_steps.shape
    lay = _train_layout(bsz)
    n = 2 * bsz
    kern_fn = functools.partial(_train_kernel, bsz=bsz, lay=lay)

    flops = nsteps * 2 * (n * d_in * LANES + n * LANES * LANES
                          + n * LANES * n + bsz * LANES * LANES)
    bytes_acc = (nsteps * (2 * bsz * d_in + bsz * LANES + LANES) + slab.size) * 4
    cost = pl.CostEstimate(flops=flops,
                           transcendentals=nsteps * (n * n + 1),
                           bytes_accessed=bytes_acc)

    logits_p, loss_p = pl.pallas_call(
        kern_fn,
        out_shape=(jax.ShapeDtypeStruct((nsteps, bsz, LANES), jnp.float32),
                   jax.ShapeDtypeStruct((nsteps, 1, LANES), jnp.float32)),
        grid_spec=pltpu.PrefetchScalarGridSpec(
            num_scalar_prefetch=0,
            grid=(nsteps,),
            in_specs=[
                pl.BlockSpec((1, bsz, d_in), lambda s: (s, 0, 0)),
                pl.BlockSpec((1, bsz, d_in), lambda s: (s, 0, 0)),
                # same block every step -> parameter slab DMA'd once
                pl.BlockSpec((lay["rows"], LANES), lambda s: (0, 0)),
            ],
            out_specs=(
                pl.BlockSpec((1, bsz, LANES), lambda s: (s, 0, 0)),
                pl.BlockSpec((1, 1, LANES), lambda s: (s, 0, 0)),
            )),
        compiler_params=pltpu.CompilerParams(
            dimension_semantics=("parallel",)),   # both TCs on v7x
        cost_estimate=cost,
    )(src_steps, tgt_steps, slab)

    return logits_p[:, :, :N_CLASS], loss_p[:, 0, 0]


# ---------------------------------------------------------------------------
# Eval kernel: relu(x @ w1 + b1) @ (w2 @ wc) + (b2 @ wc + bc)   (cls_fc folded)
# ---------------------------------------------------------------------------
def _eval_kernel(x_ref, slab_ref, logits_ref, *, lay):
    w1 = slab_ref[lay["w1"]:lay["w1"] + D_IN, :]
    b1 = slab_ref[lay["b1"]:lay["b1"] + 1, :]
    wc = slab_ref[lay["wc"]:lay["wc"] + BOT, :]
    bc = slab_ref[lay["bc"]:lay["bc"] + 1, :]
    h = jnp.maximum(jnp.dot(x_ref[...], w1, preferred_element_type=jnp.float32) + b1,
                    0.0)
    logits_ref[...] = jnp.dot(h, wc, preferred_element_type=jnp.float32) + bc


@jax.jit
def _eval_call(source, slab):
    bsz, d_in = source.shape
    lay = _eval_layout()
    kern_fn = functools.partial(_eval_kernel, lay=lay)
    cost = pl.CostEstimate(flops=2 * (bsz * d_in * LANES + bsz * LANES * LANES),
                           transcendentals=0,
                           bytes_accessed=(bsz * d_in + slab.size + bsz * LANES) * 4)
    logits_p = pl.pallas_call(
        kern_fn,
        out_shape=jax.ShapeDtypeStruct((bsz, LANES), jnp.float32),
        in_specs=[pl.BlockSpec(memory_space=_VMEM),
                  pl.BlockSpec(memory_space=_VMEM)],
        out_specs=pl.BlockSpec(memory_space=_VMEM),
        cost_estimate=cost,
    )(source, slab)
    return logits_p[:, :N_CLASS]


# ---------------------------------------------------------------------------
# DANNet wrapper (mirrors DANNet.forward)
# ---------------------------------------------------------------------------
class DANNet:
    def __init__(self, params, batch_size=B):
        self.batch_size = batch_size
        self.train_slab = build_train_slab(params, batch_size)
        self.eval_slab = build_eval_slab(params)

    def __call__(self, source, target=None, training=True):
        if not training:
            if source.ndim == 3:   # (NSTEPS, B, D_IN)
                logits = jnp.stack([_eval_call(s, self.eval_slab) for s in source])
                return logits, jnp.zeros((), jnp.float32)
            return _eval_call(source, self.eval_slab), jnp.zeros((), jnp.float32)

        assert target is not None
        if source.ndim == 2:       # single minibatch, matches torch forward
            assert source.shape[0] == self.batch_size
            logits, loss = _train_call(source[None], target[None], self.train_slab)
            return logits[0], loss[0]
        # (NSTEPS, B, D_IN): many independent minibatches in one pallas_call
        assert source.shape[1] == self.batch_size
        return _train_call(source, target, self.train_slab)


# ---------------------------------------------------------------------------
# pure-JAX reference (for a silent sanity check)
# ---------------------------------------------------------------------------
def _ref_forward(source, target, params):
    def shared(x):
        h = jnp.maximum(x @ params["w1"] + params["b1"], 0.0)
        return h @ params["w2"] + params["b2"]

    src = shared(source)
    tgt = shared(target)
    total = jnp.concatenate([src, tgt], axis=0)
    n = total.shape[0]
    bsz = n // 2
    d = total[:, None, :] - total[None, :, :]
    l2 = jnp.sum(d * d, axis=2)
    bw = jnp.sum(l2) / (n * n - n) / (KERNEL_MUL ** (KERNEL_NUM // 2))
    kern = sum(jnp.exp(-l2 / (bw * KERNEL_MUL ** i)) for i in range(KERNEL_NUM))
    loss = 0.0
    for i in range(bsz):
        s1, s2 = i, (i + 1) % bsz
        t1, t2 = s1 + bsz, s2 + bsz
        loss = loss + kern[s1, s2] + kern[t1, t2] - kern[s1, t2] - kern[s2, t1]
    loss = loss / bsz
    logits = src @ params["wc"] + params["bc"]
    return logits, loss


if __name__ == "__main__":
    key = jax.random.PRNGKey(0)
    ks = jax.random.split(key, 8)

    params = {
        "w1": jax.random.normal(ks[0], (D_IN, HID), jnp.float32) * 0.1,
        "b1": jax.random.normal(ks[1], (1, HID), jnp.float32) * 0.01,
        "w2": jax.random.normal(ks[2], (HID, BOT), jnp.float32) * 0.1,
        "b2": jax.random.normal(ks[3], (1, BOT), jnp.float32) * 0.01,
        "wc": jax.random.normal(ks[4], (BOT, N_CLASS), jnp.float32) * 0.1,
        "bc": jax.random.normal(ks[5], (1, N_CLASS), jnp.float32) * 0.01,
    }
    model = DANNet(params, batch_size=B)

    # --- single minibatch (matches DANNet.forward(source, target)) ---
    source = jax.random.normal(ks[6], (B, D_IN), jnp.float32)
    target = jax.random.normal(ks[7], (B, D_IN), jnp.float32)
    logits, loss = model(source, target, training=True)
    jax.block_until_ready((logits, loss))

    ref_logits, ref_loss = _ref_forward(source, target, params)
    assert jnp.allclose(logits, ref_logits, rtol=1e-3, atol=1e-3)
    assert jnp.allclose(loss, ref_loss, rtol=1e-2, atol=1e-2)

    # --- many independent minibatches amortized in one pallas_call ---
    NSTEPS = 4
    kb = jax.random.split(jax.random.PRNGKey(1), 2)
    sources = jax.random.normal(kb[0], (NSTEPS, B, D_IN), jnp.float32)
    targets = jax.random.normal(kb[1], (NSTEPS, B, D_IN), jnp.float32)
    logits_b, loss_b = model(sources, targets, training=True)
    jax.block_until_ready((logits_b, loss_b))
    for s in range(NSTEPS):
        rl, rloss = _ref_forward(sources[s], targets[s], params)
        assert jnp.allclose(logits_b[s], rl, rtol=1e-3, atol=1e-3)
        assert jnp.allclose(loss_b[s], rloss, rtol=1e-2, atol=1e-2)

    # --- eval path (cls_fc folded into the bottleneck) ---
    logits_eval, loss_eval = model(source, training=False)
    jax.block_until_ready(logits_eval)
    assert jnp.allclose(logits_eval, ref_logits, rtol=1e-3, atol=1e-3)
    assert float(loss_eval) == 0.0

    print("KERNEL_OK")
</pallas_src>

<mosaic_0001>
module attributes {stable_mosaic.version = 11 : i64} {
  func.func @_train_kernel(%arg0: i32, %arg1: memref<1x8x32xf32, #tpu.memory_space<vmem>>, %arg2: memref<1x8x32xf32, #tpu.memory_space<vmem>>, %arg3: memref<328x128xf32, #tpu.memory_space<vmem>>, %arg4: memref<1x8x128xf32, #tpu.memory_space<vmem>>, %arg5: memref<1x1x128xf32, #tpu.memory_space<vmem>>) attributes {dimension_semantics = [#tpu.dimension_semantics<parallel>], iteration_bounds = array<i64: 1>, scalar_prefetch = 0 : i64, scratch_operands = 0 : i64, tpu.core_type = #tpu.core_type<tc>, window_params = [{transform_indices = @transform_0, window_bounds = array<i64: 1, 8, 32>}, {transform_indices = @transform_1, window_bounds = array<i64: 1, 8, 32>}, {pipeline_mode = #tpu.pipeline_mode<synchronous>, transform_indices = @transform_2, window_bounds = array<i64: 328, 128>}, {transform_indices = @transform_3, window_bounds = array<i64: 1, 8, 128>}, {transform_indices = @transform_4, window_bounds = array<i64: 1, 1, 128>}]} {
    %c0 = arith.constant 0 : index
    %c0_0 = arith.constant 0 : index
    %c0_1 = arith.constant 0 : index
    %0 = vector.load %arg1[%c0, %c0_0, %c0_1] : memref<1x8x32xf32, #tpu.memory_space<vmem>>, vector<1x8x32xf32>
    %1 = vector.shape_cast %0 : vector<1x8x32xf32> to vector<8x32xf32>
    %c0_2 = arith.constant 0 : index
    %c0_3 = arith.constant 0 : index
    %c0_4 = arith.constant 0 : index
    %2 = vector.load %arg2[%c0_2, %c0_3, %c0_4] : memref<1x8x32xf32, #tpu.memory_space<vmem>>, vector<1x8x32xf32>
    %3 = vector.shape_cast %2 : vector<1x8x32xf32> to vector<8x32xf32>
    %4 = tpu.concatenate %1, %3 in 0 : vector<8x32xf32>, vector<8x32xf32> -> vector<16x32xf32>
    %c0_5 = arith.constant 0 : index
    %c0_6 = arith.constant 0 : index
    %5 = vector.load %arg3[%c0_5, %c0_6] : memref<328x128xf32, #tpu.memory_space<vmem>>, vector<32x128xf32>
    %c32 = arith.constant 32 : index
    %c0_7 = arith.constant 0 : index
    %6 = vector.load %arg3[%c32, %c0_7] : memref<328x128xf32, #tpu.memory_space<vmem>>, vector<1x128xf32>
    %c40 = arith.constant 40 : index
    %c0_8 = arith.constant 0 : index
    %7 = vector.load %arg3[%c40, %c0_8] : memref<328x128xf32, #tpu.memory_space<vmem>>, vector<128x128xf32>
    %c168 = arith.constant 168 : index
    %c0_9 = arith.constant 0 : index
    %8 = vector.load %arg3[%c168, %c0_9] : memref<328x128xf32, #tpu.memory_space<vmem>>, vector<1x128xf32>
    %cst = arith.constant dense<0.000000e+00> : vector<16x128xf32>
    %9 = tpu.matmul %4, %5, %cst {dimension_numbers = #tpu.dot_dimension_numbers<[1], [0], [0], [1], [0, 0, 1, 1], [], []>} : vector<16x32xf32>, vector<32x128xf32>, vector<16x128xf32> -> vector<16x128xf32>
    %10 = vector.broadcast %6 : vector<1x128xf32> to vector<16x128xf32>
    %11 = arith.addf %9, %10 : vector<16x128xf32>
    %cst_10 = arith.constant 0.000000e+00 : f32
    %12 = vector.broadcast %cst_10 : f32 to vector<16x128xf32>
    %13 = arith.maximumf %11, %12 : vector<16x128xf32>
    %cst_11 = arith.constant dense<0.000000e+00> : vector<16x128xf32>
    %14 = tpu.matmul %13, %7, %cst_11 {dimension_numbers = #tpu.dot_dimension_numbers<[1], [0], [0], [1], [0, 0, 1, 1], [], []>} : vector<16x128xf32>, vector<128x128xf32>, vector<16x128xf32> -> vector<16x128xf32>
    %15 = vector.broadcast %8 : vector<1x128xf32> to vector<16x128xf32>
    %16 = arith.addf %14, %15 : vector<16x128xf32>
    %cst_12 = arith.constant dense<0.000000e+00> : vector<16x16xf32>
    %17 = tpu.matmul %16, %16, %cst_12 {dimension_numbers = #tpu.dot_dimension_numbers<[1], [1], [0], [0], [0, 0, 1, 0], [], []>} : vector<16x128xf32>, vector<16x128xf32>, vector<16x16xf32> -> vector<16x16xf32>
    %18 = tpu.iota {dimensions = array<i32: 0>} : vector<16x16xi32>
    %19 = tpu.iota {dimensions = array<i32: 1>} : vector<16x16xi32>
    %20 = arith.cmpi eq, %18, %19 : vector<16x16xi32>
    %21 = arith.extui %20 : vector<16x16xi1> to vector<16x16xi32>
    %22 = arith.sitofp %21 : vector<16x16xi32> to vector<16x16xf32>
    %23 = arith.mulf %17, %22 : vector<16x16xf32>
    %cst_13 = arith.constant dense<0.000000e+00> : vector<16xf32>
    %24 = vector.multi_reduction <add>, %23, %cst_13 [1] : vector<16x16xf32> to vector<16xf32>
    %25 = vector.shape_cast %24 : vector<16xf32> to vector<16x1xf32>
    %cst_14 = arith.constant dense<0.000000e+00> : vector<16xf32>
    %26 = vector.multi_reduction <add>, %23, %cst_14 [0] : vector<16x16xf32> to vector<16xf32>
    %27 = vector.shape_cast %26 : vector<16xf32> to vector<1x16xf32>
    %28 = vector.broadcast %25 : vector<16x1xf32> to vector<16x16xf32>
    %29 = vector.broadcast %27 : vector<1x16xf32> to vector<16x16xf32>
    %30 = arith.addf %28, %29 : vector<16x16xf32>
    %cst_15 = arith.constant 2.000000e+00 : f32
    %31 = vector.broadcast %cst_15 : f32 to vector<16x16xf32>
    %32 = arith.mulf %31, %17 : vector<16x16xf32>
    %33 = arith.subf %30, %32 : vector<16x16xf32>
    %cst_16 = arith.constant 0.000000e+00 : f32
    %34 = vector.broadcast %cst_16 : f32 to vector<16x16xf32>
    %35 = arith.maximumf %33, %34 : vector<16x16xf32>
    %36 = vector.shape_cast %35 : vector<16x16xf32> to vector<1x16x16xf32>
    %cst_17 = arith.constant dense<0.000000e+00> : vector<1xf32>
    %37 = vector.multi_reduction <add>, %36, %cst_17 [1, 2] : vector<1x16x16xf32> to vector<1xf32>
    %38 = vector.shape_cast %37 : vector<1xf32> to vector<1x1x1xf32>
    %39 = vector.extract %38[0, 0, 0] : f32 from vector<1x1x1xf32>
    %40 = vector.broadcast %39 : f32 to vector<1x1xf32>
    %cst_18 = arith.constant 0.00104166672 : f32
    %41 = vector.broadcast %cst_18 : f32 to vector<1x1xf32>
    %42 = arith.mulf %40, %41 : vector<1x1xf32>
    %43 = tpu.reciprocal %42 {approx = true} : vector<1x1xf32> -> vector<1x1xf32>
    %cst_19 = arith.constant 0.000000e+00 : f32
    %44 = vector.broadcast %cst_19 : f32 to vector<16x16xf32>
    %45 = arith.subf %44, %35 : vector<16x16xf32>
    %46 = vector.broadcast %43 : vector<1x1xf32> to vector<16x16xf32>
    %47 = arith.mulf %45, %46 : vector<16x16xf32>
    %cst_20 = arith.constant 6.250000e-02 : f32
    %48 = vector.broadcast %cst_20 : f32 to vector<16x16xf32>
    %49 = arith.mulf %47, %48 : vector<16x16xf32>
    %50 = math.exp %49 : vector<16x16xf32>
    %51 = arith.mulf %50, %50 : vector<16x16xf32>
    %52 = arith.addf %50, %51 : vector<16x16xf32>
    %53 = arith.mulf %51, %51 : vector<16x16xf32>
    %54 = arith.addf %52, %53 : vector<16x16xf32>
    %55 = arith.mulf %53, %53 : vector<16x16xf32>
    %56 = arith.addf %54, %55 : vector<16x16xf32>
    %57 = arith.mulf %55, %55 : vector<16x16xf32>
    %58 = arith.addf %56, %57 : vector<16x16xf32>
    %c312 = arith.constant 312 : index
    %c0_21 = arith.constant 0 : index
    %59 = vector.load %arg3[%c312, %c0_21] : memref<328x128xf32, #tpu.memory_space<vmem>>, vector<16x16xf32>
    %60 = arith.mulf %58, %59 : vector<16x16xf32>
    %61 = vector.shape_cast %60 : vector<16x16xf32> to vector<1x16x16xf32>
    %cst_22 = arith.constant dense<0.000000e+00> : vector<1xf32>
    %62 = vector.multi_reduction <add>, %61, %cst_22 [1, 2] : vector<1x16x16xf32> to vector<1xf32>
    %63 = vector.shape_cast %62 : vector<1xf32> to vector<1x1x1xf32>
    %64 = vector.extract %63[0, 0, 0] : f32 from vector<1x1x1xf32>
    %65 = vector.broadcast %64 : f32 to vector<1x1xf32>
    %cst_23 = arith.constant 1.250000e-01 : f32
    %66 = vector.broadcast %cst_23 : f32 to vector<1x1xf32>
    %67 = arith.mulf %65, %66 : vector<1x1xf32>
    %68 = vector.shape_cast %67 : vector<1x1xf32> to vector<1x1xf32>
    %69 = vector.broadcast %68 : vector<1x1xf32> to vector<1x128xf32>
    %c0_24 = arith.constant 0 : index
    %c0_25 = arith.constant 0 : index
    %c0_26 = arith.constant 0 : index
    %70 = vector.load %arg5[%c0_24, %c0_25, %c0_26] : memref<1x1x128xf32, #tpu.memory_space<vmem>>, vector<1x1x128xf32>
    %71 = vector.shape_cast %70 : vector<1x1x128xf32> to vector<1x128xf32>
    %72 = vector.shape_cast %69 : vector<1x128xf32> to vector<1x1x128xf32>
    tpu.vector_store %arg5[%c0_24, %c0_25, %c0_26], %72 {strides = array<i32>} : memref<1x1x128xf32, #tpu.memory_space<vmem>>, vector<1x1x128xf32>,
    %c176 = arith.constant 176 : index
    %c0_27 = arith.constant 0 : index
    %73 = vector.load %arg3[%c176, %c0_27] : memref<328x128xf32, #tpu.memory_space<vmem>>, vector<128x128xf32>
    %c304 = arith.constant 304 : index
    %c0_28 = arith.constant 0 : index
    %74 = vector.load %arg3[%c304, %c0_28] : memref<328x128xf32, #tpu.memory_space<vmem>>, vector<1x128xf32>
    %75 = vector.extract_strided_slice %16 {offsets = [0, 0], sizes = [8, 128], strides = [1, 1]} : vector<16x128xf32> to vector<8x128xf32>
    %cst_29 = arith.constant dense<0.000000e+00> : vector<8x128xf32>
    %76 = tpu.matmul %75, %73, %cst_29 {dimension_numbers = #tpu.dot_dimension_numbers<[1], [0], [0], [1], [0, 0, 1, 1], [], []>} : vector<8x128xf32>, vector<128x128xf32>, vector<8x128xf32> -> vector<8x128xf32>
    %77 = vector.broadcast %74 : vector<1x128xf32> to vector<8x128xf32>
    %78 = arith.addf %76, %77 : vector<8x128xf32>
    %c0_30 = arith.constant 0 : index
    %c0_31 = arith.constant 0 : index
    %c0_32 = arith.constant 0 : index
    %79 = vector.load %arg4[%c0_30, %c0_31, %c0_32] : memref<1x8x128xf32, #tpu.memory_space<vmem>>, vector<1x8x128xf32>
    %80 = vector.shape_cast %79 : vector<1x8x128xf32> to vector<8x128xf32>
    %81 = vector.shape_cast %78 : vector<8x128xf32> to vector<1x8x128xf32>
    tpu.vector_store %arg4[%c0_30, %c0_31, %c0_32], %81 {strides = array<i32>} : memref<1x8x128xf32, #tpu.memory_space<vmem>>, vector<1x8x128xf32>,
    return
  }
  func.func @transform_0(%arg0: i32) -> (i32, i32, i32) {
    %c0_i32 = arith.constant 0 : i32
    %c0_i32_0 = arith.constant 0 : i32
    %c0_i32_1 = arith.constant 0 : i32
    return %arg0, %c0_i32, %c0_i32_0 : i32, i32, i32
  }
  func.func @transform_1(%arg0: i32) -> (i32, i32, i32) {
    %c0_i32 = arith.constant 0 : i32
    %c0_i32_0 = arith.constant 0 : i32
    %c0_i32_1 = arith.constant 0 : i32
    return %arg0, %c0_i32, %c0_i32_0 : i32, i32, i32
  }
  func.func @transform_2(%arg0: i32) -> (i32, i32) {
    %c0_i32 = arith.constant 0 : i32
    %c0_i32_0 = arith.constant 0 : i32
    %c0_i32_1 = arith.constant 0 : i32
    return %c0_i32, %c0_i32_0 : i32, i32
  }
  func.func @transform_3(%arg0: i32) -> (i32, i32, i32) {
    %c0_i32 = arith.constant 0 : i32
    %c0_i32_0 = arith.constant 0 : i32
    %c0_i32_1 = arith.constant 0 : i32
    return %arg0, %c0_i32, %c0_i32_0 : i32, i32, i32
  }
  func.func @transform_4(%arg0: i32) -> (i32, i32, i32) {
    %c0_i32 = arith.constant 0 : i32
    %c0_i32_0 = arith.constant 0 : i32
    %c0_i32_1 = arith.constant 0 : i32
    return %arg0, %c0_i32, %c0_i32_0 : i32, i32, i32
  }
}

</mosaic_0001>

<bundles_post_ra>
// kernel: _train_call.1
= control target key start
LH: loop header
LB: loop body
LE: loop exit
PB: predicated region body
PF: predicated region fallthrough
CT: control target
= control target key end

     0   :  { %10 = vsyncpa [#allocation3], 0  ;;  %s499_s0 = inlined_call_operand.hbm [shape: f32[1,8,32], index: 0, kind: input, shape index: {}]   ;;  %s500_s1 = inlined_call_operand.hbm [shape: f32[1,8,32], index: 1, kind: input, shape index: {}]   ;;  %s501_s2 = inlined_call_operand.hbm [shape: f32[328,128], index: 2, kind: input, shape index: {}]   ;;  %s502_s3 = inlined_call_operand.vmem [shape: f32[1,8,128], index: 3, kind: output, shape index: {0}]   ;;  %s503_s4 = inlined_call_operand.hbm [shape: f32[1,1,128], index: 4, kind: output, shape index: {1}]  }
   0x1   :  { %11 = vsyncpa [#allocation6], 0  ;;  %s29_s17 = sshll.u32 %s500_s1, 4  ;;  %s30_s17 = int_to_ptr.hbm [resolvable:$true] %s29_s17 }
   0x2   :  { %12 = vsyncpa [#allocation4], 0  ;;  %s446_s18 = smov [#allocation5]   ;;  %s18_s22 = sshll.u32 %s499_s0, 4  ;;  %s19_s22 = int_to_ptr.hbm [resolvable:$true] %s18_s22 }
   0x3   :  { %s31_s19 = sshll.u32 %s446_s18, 4  ;;  %s447_s23 = smov [#allocation2]   ;;  %s32_s19 = int_to_ptr.vmem [resolvable:$true] %s31_s19 }
   0x4   :  { %34 = dma.hbm_to_vmem [thread:$0]  %s30_s17, 128, %s32_s19, [#allocation6]  }
   0x5   :  { %s20_s24 = sshll.u32 %s447_s23, 4  ;;  %s39_s27 = sshll.u32 %s501_s2, 4  ;;  %s21_s24 = int_to_ptr.vmem [resolvable:$true] %s20_s24  ;;  %s40_s27 = int_to_ptr.hbm [resolvable:$true] %s39_s27 }
   0x6   :  { %23 = dma.hbm_to_vmem [thread:$0]  %s19_s22, 128, %s21_s24, [#allocation3]  }
   0x7   :  { %s448_s1 = smov [#allocation7]   ;;  %s449_s29 = smov 128  }
   0x8   :  { %s41_s28 = sshll.u32 %s448_s1, 4  ;;  %s450_s30 = smov 8   ;;  %s42_s28 = int_to_ptr.vmem [resolvable:$true] %s41_s28 }
   0x9   :  { %47 = dma.hbm_to_vmem [thread:$0]  %s40_s27, 5248, %s42_s28, [#allocation6], %s449_s29, %s449_s29, %s450_s30  }
   0xa   :  { %440 = dma.done.wait [#allocation3], 128  }
   0xb   :  { %441 = vsyncadd [#allocation3], 4294967168 }
   0xc   :  { %442 = dma.done.wait [#allocation6], 5376  }
   0xd   :  { %443 = vsyncadd [#allocation6], 4294961920  ;;  %v65_v0 = vld [vmem:[#allocation7 + $0x18] sm:$0xff]  ;;  %v64_v1 = vld [vmem:[#allocation7 + $0x10] sm:$0xff]  ;;  %vm85_vm0 = vcmask 261120   ;;  %v164_v53 = vlaneseq  ;;  %v451_v56 = vmov 0.0  }
   0xe   :  { %104 = vmatpush.msra.mxu0 %v65_v0  ;;  %v63_v2 = vld [vmem:[#allocation7 + $0x8] sm:$0xff]  ;;  %v82_v3 = vld [vmem:[#allocation7 + $0xa0] sm:$0xff]  ;;  %v81_v4 = vld [vmem:[#allocation7 + $0x98] sm:$0xff]  ;;  %vm177_vm2 = vcmask 130048   ;;  %s452_s5 = smov [#allocation8]   ;;  %s307_s9 = sshll.u32 %s503_s4, 4  ;;  %s308_s9 = int_to_ptr.hbm [resolvable:$true] %s307_s9 }
   0xf   :  { %118 = vmatpush.msra.mxu1 %v82_v3  ;;  %v62_v5 = vld [vmem:[#allocation7] sm:$0xff]  ;;  %v80_v6 = vld [vmem:[#allocation7 + $0x90] sm:$0xff]  ;;  %v79_v8 = vld [vmem:[#allocation7 + $0x88] sm:$0xff]  ;;  %v165_v54 = vshrl.u32 %v164_v53, 7  ;;  %v168_v55 = vand.u32 127, %v164_v53  ;;  %s305_s6 = sshll.u32 %s452_s5, 4  ;;  %s306_s6 = int_to_ptr.vmem [resolvable:$true] %s305_s6 }
  0x10   :  { %105 = vmatpush.msra.mxu0 %v64_v1  ;;  %v60_v7 = vld [vmem:[#allocation2] sm:$0xff]  ;;  %v78_v9 = vld [vmem:[#allocation7 + $0x80] sm:$0xff]  ;;  %v77_v10 = vld [vmem:[#allocation7 + $0x78] sm:$0xff] }
  0x11   :  { %119 = vmatpush.msra.mxu1 %v81_v4  ;;  %v76_v11 = vld [vmem:[#allocation7 + $0x70] sm:$0xff]  ;;  %v61_v12 = vld [vmem:[#allocation5] sm:$0xff]  ;;  %v75_v13 = vld [vmem:[#allocation7 + $0x68] sm:$0xff]  ;;  %vm169_vm1 = vcmp.eq.s32.totalorder %v165_v54, %v168_v55  ;;  %v166_v58 = vadd.s32 8, %v165_v54 }
  0x12   :  { %106 = vmatpush.msra.mxu0 %v63_v2  ;;  %v74_v14 = vld [vmem:[#allocation7 + $0x60] sm:$0xff]  ;;  %v73_v15 = vld [vmem:[#allocation7 + $0x58] sm:$0xff]  ;;  %v72_v16 = vld [vmem:[#allocation7 + $0x50] sm:$0xff]  ;;  %v322_v57 = vsel %vm169_vm1, 1.0, %v451_v56 }
  0x13   :  { %120 = vmatpush.msra.mxu1 %v80_v6  ;;  %v71_v17 = vld [vmem:[#allocation7 + $0x48] sm:$0xff]  ;;  %v70_v18 = vld [vmem:[#allocation7 + $0x40] sm:$0xff]  ;;  %v69_v19 = vld [vmem:[#allocation7 + $0x38] sm:$0xff]  ;;  %vm170_vm3 = vcmp.eq.s32.totalorder %v166_v58, %v168_v55 }
  0x14   :  { %107 = vmatpush.msra.mxu0 %v62_v5  ;;  %v68_v20 = vld [vmem:[#allocation7 + $0x30] sm:$0xff]  ;;  %v67_v21 = vld [vmem:[#allocation7 + $0x28] sm:$0xff]  ;;  %v273_v23 = vld [vmem:[#allocation7 + $0x120] sm:$0xff]  ;;  %v323_v62 = vsel %vm170_vm3, 1.0, %v451_v56 }
  0x15   :  { %320 = vmatmul.msk.f32.vlgmr.msra.gmra.mxu0 %vm85_vm0, %v60_v7  ;;  %121 = vmatpush.msra.mxu1 %v79_v8  ;;  %v274_v22 = vld [vmem:[#allocation7 + $0x128] sm:$0xff]  ;;  %v272_v24 = vld [vmem:[#allocation7 + $0x118] sm:$0xff]  ;;  %v271_v25 = vld [vmem:[#allocation7 + $0x110] sm:$0xff] }
  0x16   :  { %277 = vmatpush.msra.mxu3 %v274_v22  ;;  %v270_v26 = vld [vmem:[#allocation7 + $0x108] sm:$0xff]  ;;  %v269_v27 = vld [vmem:[#allocation7 + $0x100] sm:$0xff]  ;;  %v268_v28 = vld [vmem:[#allocation7 + $0xf8] sm:$0xff] }
  0x17   :  { %122 = vmatpush.msra.mxu1 %v78_v9  ;;  %v267_v29 = vld [vmem:[#allocation7 + $0xf0] sm:$0xff]  ;;  %v266_v30 = vld [vmem:[#allocation7 + $0xe8] sm:$0xff]  ;;  %v335_v31 = vld [vmem:[#allocation7 + $0x20] ss:$0 sm:$0xff] }
  0x18   :  { %278 = vmatpush.msra.mxu3 %v273_v23  ;;  %v265_v32 = vld [vmem:[#allocation7 + $0xe0] sm:$0xff]  ;;  %v264_v33 = vld [vmem:[#allocation7 + $0xd8] sm:$0xff]  ;;  %v263_v36 = vld [vmem:[#allocation7 + $0xd0] sm:$0xff] }
  0x19   :  { %123 = vmatpush.msra.mxu1 %v77_v10  ;;  %v262_v38 = vld [vmem:[#allocation7 + $0xc8] sm:$0xff]  ;;  %v261_v39 = vld [vmem:[#allocation7 + $0xc0] sm:$0xff]  ;;  %v260_v43 = vld [vmem:[#allocation7 + $0xb8] sm:$0xff] }
  0x1a   :  { %279 = vmatpush.msra.mxu3 %v272_v24  ;;  %v259_v44 = vld [vmem:[#allocation7 + $0xb0] sm:$0xff]  ;;  %v336_v45 = vld [vmem:[#allocation7 + $0xa8] ss:$0 sm:$0xff]  ;;  %v240_v56 = vld [vmem:[#allocation7 + $0x138] sm:$0xff] }
  0x1b   :  { %124 = vmatpush.msra.mxu1 %v76_v11  ;;  %v337_v50 = vld [vmem:[#allocation7 + $0x130] ss:$0 sm:$0xff]  ;;  %v241_v58 = vld [vmem:[#allocation7 + $0x140] sm:$0xff] }
  0x1c   :  { %280 = vmatpush.msra.mxu3 %v271_v25 }
  0x1d   :  { %321 = vmatmul.msk.f32.gmra.mxu0 %vm85_vm0, %v61_v12  ;;  %125 = vmatpush.msra.mxu1 %v75_v13 }
  0x1e   :  { %281 = vmatpush.msra.mxu3 %v270_v26 }
  0x1f   :  { %126 = vmatpush.msra.mxu1 %v74_v14 }
  0x20   :  { %282 = vmatpush.msra.mxu3 %v269_v27 }
  0x21   :  { %127 = vmatpush.msra.mxu1 %v73_v15 }
  0x22   :  { %283 = vmatpush.msra.mxu3 %v268_v28 }
  0x23   :  { %128 = vmatpush.msra.mxu1 %v72_v16 }
  0x24   :  { %284 = vmatpush.msra.mxu3 %v267_v29 }
  0x25   :  { %129 = vmatpush.msra.mxu1 %v71_v17 }
  0x26   :  { %285 = vmatpush.msra.mxu3 %v266_v30 }
  0x27   :  { %130 = vmatpush.msra.mxu1 %v70_v18 }
  0x28   :  { %286 = vmatpush.msra.mxu3 %v265_v32 }
  0x29   :  { %131 = vmatpush.msra.mxu1 %v69_v19 }
  0x2a   :  { %287 = vmatpush.msra.mxu3 %v264_v33 }
  0x2b   :  { %132 = vmatpush.msra.mxu1 %v68_v20 }
  0x2c   :  { %288 = vmatpush.msra.mxu3 %v263_v36 }
  0x2d   :  { %133 = vmatpush.msra.mxu1 %v67_v21 }
  0x2e   :  { %289 = vmatpush.msra.mxu3 %v262_v38 }
  0x30   :  { %290 = vmatpush.msra.mxu3 %v261_v39 }
  0x32   :  { %291 = vmatpush.msra.mxu3 %v260_v43 }
  0x34   :  { %292 = vmatpush.msra.mxu3 %v259_v44 }
  0x92   :  { %v109_v34 = vpop.f32.mrf.mxu0 }
  0x93   :  { %v110_v35 = vadd.f32 %v335_v31, %v109_v34 }
  0x95   :  { %v115_v37 = vmax.f32 %v110_v35, 0.0 }
  0x97   :  { %134 = vmatmul.f32.vlgmr.msra.gmra.mxu1 %v115_v37 }
  0x9a   :  { %v112_v40 = vpop.f32.mrf.mxu0 }
  0x9b   :  { %v113_v41 = vadd.f32 %v335_v31, %v112_v40 }
  0x9d   :  { %v116_v42 = vmax.f32 %v113_v41, 0.0 }
  0x9f   :  { %137 = vmatmul.f32.gmra.mxu1 %v116_v42 }
 0x114   :  { %v135_v46 = vpop.f32.mrf.mxu1 }
 0x115   :  { %v136_v47 = vadd.f32 %v336_v45, %v135_v46 }
 0x117   :  { %293 = vmatmul.f32.vlgmr.msra.gmra.mxu3 %v136_v47 }
 0x11c   :  { %v138_v48 = vpop.f32.mrf.mxu1 }
 0x11d   :  { %v139_v49 = vadd.f32 %v336_v45, %v138_v48 }
 0x11f   :  { %155 = vmatpush.xpose.msra.mxu2 %v139_v49 }
 0x123   :  { %156 = vmatpush.xpose.msra.mxu2 %v136_v47 }
 0x126   :  { %157 = vmatmul.f32.vlgmr.msra.gmra.mxu2 %v136_v47 }
 0x12e   :  { %160 = vmatmul.f32.gmra.mxu2 %v139_v49 }
 0x19a   :  { %v294_v51 = vpop.f32.mrf.mxu3 }
 0x19b   :  { %v295_v52 = vadd.f32 %v337_v50, %v294_v51 }
 0x19d   :  { %297 = vst [vmem:[%s502_s3] sm:$0xff] %v295_v52 }
 0x1a9   :  { %v158_v59 = vpop.f32.mrf.mxu2 }
 0x1aa   :  { %v175_v60 = vmul.f32 %v322_v57, %v158_v59  ;;  %v193_v10 = vmul.f32 2.0, %v158_v59 }
 0x1ac   :  { %v178_v61 = vsel %vm177_vm2, %v175_v60, 0.0 }
 0x1ad   :  { %179 = vadd.xlane.f32.xlu0 %v178_v61 }
 0x1b1   :  { %v161_v63 = vpop.f32.mrf.mxu2 }
 0x1b2   :  { %v176_v0 = vmul.f32 %v323_v62, %v161_v63  ;;  %v194_v14 = vmul.f32 2.0, %v161_v63 }
 0x1b4   :  { %v181_v1 = vsel %vm177_vm2, %v176_v0, 0.0 }
 0x1b5   :  { %182 = vadd.xlane.f32.xlu0 %v181_v1  ;;  %v184_v2 = vadd.f32 %v181_v1, %v178_v61 }
 0x1b7   :  { %v185_v3 = vrot.slane %v184_v2, 4 }
 0x1b9   :  { %v186_v4 = vadd.f32 %v185_v3, %v184_v2 }
 0x1bb   :  { %v187_v5 = vrot.slane %v186_v4, 2 }
 0x1bd   :  { %v188_v6 = vadd.f32 %v187_v5, %v186_v4 }
 0x1bf   :  { %v189_v7 = vrot.slane %v188_v6, 1 }
 0x1c1   :  { %v190_v8 = vadd.f32 %v189_v7, %v188_v6 }
 0x220   :  { %v180_v9 = vpop.xlane.xlu0 %179 }
 0x221   :  { %v191_v11 = vadd.f32 %v190_v8, %v180_v9 }
 0x223   :  { %v195_v12 = vsub.f32 %v191_v11, %v193_v10 }
 0x225   :  { %v197_v17 = vmax.f32 %v195_v12, 0.0 }
 0x227   :  { %v199_v19 = vsel %vm177_vm2, %v197_v17, 0.0  ;;  %v214_v31 = vsub.f32 0.0, %v197_v17 }
 0x228   :  { %v183_v13 = vpop.xlane.xlu0 %182 }
 0x229   :  { %v192_v15 = vadd.f32 %v190_v8, %v183_v13 }
 0x22b   :  { %v196_v16 = vsub.f32 %v192_v15, %v194_v14 }
 0x22d   :  { %v198_v18 = vmax.f32 %v196_v16, 0.0 }
 0x22f   :  { %v200_v20 = vsel %vm177_vm2, %v198_v18, 0.0  ;;  %v215_v32 = vsub.f32 0.0, %v198_v18 }
 0x230   :  { %v201_v21 = vadd.f32 %v200_v20, %v199_v19 }
 0x232   :  { %202 = vadd.xlane.f32.xlu1 %v201_v21 }
 0x2a5   :  { %v203_v22 = vpop.xlane.xlu1 %202 }
 0x2a6   :  { %v204_v23 = vrot.slane %v203_v22, 4 }
 0x2a8   :  { %v205_v24 = vadd.f32 %v204_v23, %v203_v22 }
 0x2aa   :  { %v206_v25 = vrot.slane %v205_v24, 2 }
 0x2ac   :  { %v207_v26 = vadd.f32 %v206_v25, %v205_v24 }
 0x2ae   :  { %v208_v27 = vrot.slane %v207_v26, 1 }
 0x2b0   :  { %v209_v28 = vadd.f32 %v208_v27, %v207_v26 }
 0x2b2   :  { %324 = vpush %v209_v28 }
 0x2e3   :  { %s325_s3 = spop %324 }
 0x2e4   :  { %v211_v29 = vstv %s325_s3 }
 0x2e5   :  { %v212_v30 = vmul.f32 0.0010416667, %v211_v29 }
 0x2e7   :  { %338 = vrcp.f32 %v212_v30 }
 0x2ed   :  { %v339_v33 = vpop.eup %338 }
 0x2ee   :  { %v216_v34 = vmul.f32 %v339_v33, %v214_v31  ;;  %v217_v35 = vmul.f32 %v339_v33, %v215_v32 }
 0x2f0   :  { %v218_v36 = vmul.f32 0.0625, %v216_v34  ;;  %v219_v37 = vmul.f32 0.0625, %v217_v35 }
 0x2f2   :  { %v220_v38 = vmul.f32 1.442695, %v218_v36  ;;  %v222_v39 = vmul.f32 1.442695, %v219_v37 }
 0x2f4   :  { %340 = vpow2.f32 %v220_v38 }
 0x2f5   :  { %342 = vpow2.f32 %v222_v39 }
 0x2fa   :  { %v341_v40 = vpop.eup %340 }
 0x2fb   :  { %v343_v41 = vpop.eup %342  ;;  %v224_v42 = vmul.f32 %v341_v40, %v341_v40 }
 0x2fc   :  { %v225_v43 = vmul.f32 %v343_v41, %v343_v41 }
 0x2fd   :  { %v226_v44 = vadd.f32 %v341_v40, %v224_v42  ;;  %v228_v45 = vmul.f32 %v224_v42, %v224_v42 }
 0x2fe   :  { %v227_v46 = vadd.f32 %v343_v41, %v225_v43  ;;  %v229_v47 = vmul.f32 %v225_v43, %v225_v43 }
 0x2ff   :  { %v230_v48 = vadd.f32 %v228_v45, %v226_v44  ;;  %v232_v49 = vmul.f32 %v228_v45, %v228_v45 }
 0x300   :  { %v231_v50 = vadd.f32 %v229_v47, %v227_v46  ;;  %v233_v51 = vmul.f32 %v229_v47, %v229_v47 }
 0x301   :  { %v234_v52 = vadd.f32 %v232_v49, %v230_v48  ;;  %v236_v53 = vmul.f32 %v232_v49, %v232_v49 }
 0x302   :  { %v235_v54 = vadd.f32 %v233_v51, %v231_v50  ;;  %v237_v55 = vmul.f32 %v233_v51, %v233_v51 }
 0x303   :  { %v238_v57 = vadd.f32 %v236_v53, %v234_v52 }
 0x304   :  { %v239_v59 = vadd.f32 %v237_v55, %v235_v54 }
 0x305   :  { %v242_v60 = vmul.f32 %v240_v56, %v238_v57 }
 0x306   :  { %v243_v61 = vmul.f32 %v241_v58, %v239_v59 }
 0x307   :  { %v244_v62 = vsel %vm177_vm2, %v242_v60, 0.0 }
 0x308   :  { %v245_v63 = vsel %vm177_vm2, %v243_v61, 0.0 }
 0x309   :  { %v246_v0 = vadd.f32 %v245_v63, %v244_v62 }
 0x30b   :  { %247 = vadd.xlane.f32.xlu1 %v246_v0 }
 0x37e   :  { %v248_v1 = vpop.xlane.xlu1 %247 }
 0x37f   :  { %v249_v2 = vrot.slane %v248_v1, 4 }
 0x381   :  { %v250_v3 = vadd.f32 %v249_v2, %v248_v1 }
 0x383   :  { %v251_v4 = vrot.slane %v250_v3, 2 }
 0x385   :  { %v252_v5 = vadd.f32 %v251_v4, %v250_v3 }
 0x387   :  { %v253_v6 = vrot.slane %v252_v5, 1 }
 0x389   :  { %v254_v7 = vadd.f32 %v253_v6, %v252_v5 }
 0x38b   :  { %326 = vpush %v254_v7 }
 0x3bc   :  { %s327_s10 = spop %326 }
 0x3bd   :  { %v256_v8 = vstv %s327_s10 }
 0x3be   :  { %v257_v9 = vmul.f32 0.125, %v256_v8 }
 0x3c0   :  { %258 = vst [vmem:[#allocation8] sm:$0x1] %v257_v9 }
 0x3c1   :  { %310 = dma.vmem_to_hbm [thread:$0]  %s306_s6, 16, %s308_s9, [#allocation4]  }
 0x3c2   :  { %444 = dma.done.wait [#allocation4], 16  }
 0x3c3   :  { %445 = vsyncadd [#allocation4], 4294967280 }
 0x3c4   :  { %317 = vsyncpa [#allocation3], 1 }
 0x3c5   :  { %318 = vsyncpa [#allocation6], 1 }
 0x3c6   :  { %319 = vsyncpa [#allocation4], 1 }

</bundles_post_ra>
